<compile_context>
chip_gen: v5e
topology: v5e:2x2
jax: 0.10.0
libtpu: 0.0.40
codegen_flags: <defaults>
</compile_context>

<pallas_src>
import jax
import jax.numpy as jnp
from jax.experimental import pallas as pl
from jax.experimental.pallas import tpu as pltpu


def _round_up(n, m):
    return (n + m - 1) // m * m


def _mlp_regression_kernel(x_ref, w1t_ref, b1_ref, w2_ref, b2_ref, out_ref):
    # x_ref  : [TILE_B, D]  (f32 or bf16)  streamed per grid step
    # w1t_ref: [H, D]       (same dtype)   resident, W1 pre-transposed
    # b1_ref : [H, 1]  f32                 resident (broadcasts over lanes)
    # w2_ref : [1, H]  f32                 resident (W2 as a lane-major row)
    # b2_ref : [1]     f32  SMEM scalar
    # out_ref: [1, TILE_B] f32             batch on the lane axis -> dense stores
    x = x_ref[...]

    # Layer 1, batch-on-lanes: (H, D) . (TILE_B, D)^T -> (H, TILE_B), f32 acc.
    h1 = jax.lax.dot_general(
        w1t_ref[...], x,
        dimension_numbers=(((1,), (1,)), ((), ())),
        preferred_element_type=jnp.float32,
    )
    h1 = jnp.maximum(h1 + b1_ref[...], 0.0)                      # (H, TILE_B)

    # TODO(synk): F.dropout (training mode) not implemented; module default is
    # with_dropout=False and this is the inference (y=None) path.

    # Layer 2: (1, H) @ (H, TILE_B) -> (1, TILE_B), lane-dense result.
    pred = jnp.dot(w2_ref[...], h1, preferred_element_type=jnp.float32)

    out_ref[...] = (pred + b2_ref[0]).astype(out_ref.dtype)


def mlp_regression_forward(x, w1, b1, w2, b2, *, tile_b=4096, use_bf16=False):
    """MLPRegression.forward (y=None): relu(x @ w1 + b1) @ w2 + b2, squeezed.

    x: [B, D] f32. w1: [D, H], b1: [H], w2: [H, 1], b2: [1]. Returns pred [B] f32.
    """
    assert tile_b % 128 == 0, "tile_b must be a multiple of 128 (lane-dense output)"
    B, D = x.shape
    H = w1.shape[1]

    # --- batch tile selection -------------------------------------------------
    # Small B: one tile (rounded to the 8-sublane multiple).  Larger B: tiles are
    # multiples of 128 (lane-dense (1, TILE_B) output blocks) and we guarantee
    # >= 2 grid steps so v7x megacore ("parallel") gives both TensorCores work.
    if B <= 256:
        TILE_B = _round_up(max(B, 1), 8)
    else:
        TILE_B = min(tile_b, _round_up(pl.cdiv(B, 2), 128))
    B_pad = _round_up(B, TILE_B)
    num_tiles = B_pad // TILE_B

    if B_pad != B:
        x = jnp.pad(x, ((0, B_pad - B), (0, 0)))

    in_dtype = jnp.bfloat16 if use_bf16 else jnp.float32
    x = x.astype(in_dtype)
    w1t = jnp.asarray(w1).astype(in_dtype).T        # (H, D): layer-1 LHS, pre-transposed
    b1_col = b1.reshape(H, 1).astype(jnp.float32)   # broadcasts over lanes in-kernel
    w2_row = w2.reshape(1, H).astype(jnp.float32)   # lane-major row
    b2_1d = b2.reshape(1).astype(jnp.float32)       # scalar bias -> SMEM

    # Resident (constant index_map) weight blocks: single pipeline buffer to save
    # VMEM headroom (matters for production-size W1, esp. on v7x's 32 MiB scoped).
    def resident(shape):
        return pl.BlockSpec(shape, lambda i: (0,) * len(shape),
                            pipeline_mode=pl.Buffered(1))

    # VMEM budget (x is lane-padded to 128 and double-buffered); only raise the
    # scoped limit when needed so v5e's 16 MiB default is respected otherwise.
    itemsize = jnp.dtype(in_dtype).itemsize
    est_vmem = (2 * TILE_B * max(D, 128) * itemsize      # x double buffer
                + 2 * 8 * TILE_B * 4                     # out block (sublane-padded) x2
                + _round_up(H, 8) * TILE_B * 4           # h1 intermediate
                + 2 * (D * H + 2 * H) * 4)               # weights (generous)
    compiler_kwargs = dict(dimension_semantics=("parallel",))
    if est_vmem > 12 * 1024 * 1024:
        compiler_kwargs["vmem_limit_bytes"] = int(min(2 * est_vmem, 96 * 1024 * 1024))

    cost = pl.CostEstimate(
        flops=int(2 * B_pad * D * H + 2 * B_pad * H),
        transcendentals=0,
        bytes_accessed=int(B_pad * D * itemsize + D * H * itemsize
                           + (2 * H + 1) * 4 + B_pad * 4),
    )

    out = pl.pallas_call(
        _mlp_regression_kernel,
        out_shape=jax.ShapeDtypeStruct((1, B_pad), jnp.float32),
        grid_spec=pltpu.PrefetchScalarGridSpec(
            num_scalar_prefetch=0,
            grid=(num_tiles,),
            in_specs=[
                pl.BlockSpec((TILE_B, D), lambda i: (i, 0)),        # x: streamed
                resident((H, D)),                                   # W1^T: resident
                resident((H, 1)),                                   # b1:   resident
                resident((1, H)),                                   # w2:   resident
                pl.BlockSpec(memory_space=pltpu.MemorySpace.SMEM),  # b2 scalar
            ],
            out_specs=pl.BlockSpec((1, TILE_B), lambda i: (0, i)),  # lane-dense
        ),
        compiler_params=pltpu.CompilerParams(**compiler_kwargs),
        cost_estimate=cost,
    )(x, w1t, b1_col, w2_row, b2_1d)

    return out[0, :B]


if __name__ == "__main__":
    key = jax.random.PRNGKey(0)
    k_x, k_w1, k_b1, k_w2, k_b2, k_x2 = jax.random.split(key, 6)

    # Small shapes consistent with the module: batch=8, input_size=32, hidden_size=16
    B, D, H = 8, 32, 16

    x = jax.random.normal(k_x, (B, D), dtype=jnp.float32)
    # Synthetic parameters mirroring Linear shapes, stored [in, out]
    w1 = 0.1 * jax.random.normal(k_w1, (D, H), dtype=jnp.float32)
    b1 = 0.1 * jax.random.normal(k_b1, (H,), dtype=jnp.float32)
    w2 = 0.1 * jax.random.normal(k_w2, (H, 1), dtype=jnp.float32)
    b2 = 0.1 * jax.random.normal(k_b2, (1,), dtype=jnp.float32)

    def ref_forward(xv):
        h1 = jnp.maximum(xv @ w1 + b1, 0.0)
        return (h1 @ w2 + b2)[:, 0]

    # f32 path, single small tile.
    pred = mlp_regression_forward(x, w1, b1, w2, b2)
    jax.block_until_ready(pred)
    assert pred.shape == (B,)
    assert jnp.allclose(pred, ref_forward(x), atol=1e-5, rtol=1e-5)

    # Multi-tile / padded / lane-dense path (>= 2 grid steps, TILE_B multiple of 128).
    B2 = 1000
    x2 = jax.random.normal(k_x2, (B2, D), dtype=jnp.float32)
    pred2 = mlp_regression_forward(x2, w1, b1, w2, b2)
    jax.block_until_ready(pred2)
    assert pred2.shape == (B2,)
    assert jnp.allclose(pred2, ref_forward(x2), atol=1e-4, rtol=1e-4)

    # bf16 input/weight path (f32 accumulation); looser tolerance vs f32 reference.
    pred3 = mlp_regression_forward(x2, w1, b1, w2, b2, use_bf16=True)
    jax.block_until_ready(pred3)
    assert jnp.allclose(pred3, ref_forward(x2), atol=2e-2, rtol=5e-2)

    print("KERNEL_OK")
</pallas_src>

<mosaic_0001>
module attributes {stable_mosaic.version = 11 : i64} {
  func.func @_mlp_regression_kernel(%arg0: i32, %arg1: memref<8x32xf32, #tpu.memory_space<vmem>>, %arg2: memref<16x32xf32, #tpu.memory_space<vmem>>, %arg3: memref<16x1xf32, #tpu.memory_space<vmem>>, %arg4: memref<1x16xf32, #tpu.memory_space<vmem>>, %arg5: memref<1xf32, #tpu.memory_space<smem>>, %arg6: memref<1x8xf32, #tpu.memory_space<vmem>>) attributes {dimension_semantics = [#tpu.dimension_semantics<parallel>], iteration_bounds = array<i64: 1>, scalar_prefetch = 0 : i64, scratch_operands = 0 : i64, tpu.core_type = #tpu.core_type<tc>, window_params = [{transform_indices = @transform_0, window_bounds = array<i64: 8, 32>}, {pipeline_mode = #tpu.pipeline_mode<synchronous>, transform_indices = @transform_1, window_bounds = array<i64: 16, 32>}, {pipeline_mode = #tpu.pipeline_mode<synchronous>, transform_indices = @transform_2, window_bounds = array<i64: 16, 1>}, {pipeline_mode = #tpu.pipeline_mode<synchronous>, transform_indices = @transform_3, window_bounds = array<i64: 1, 16>}, {transform_indices = @transform_4, window_bounds = array<i64: 1>}, {transform_indices = @transform_5, window_bounds = array<i64: 1, 8>}]} {
    %c0 = arith.constant 0 : index
    %c0_0 = arith.constant 0 : index
    %0 = vector.load %arg1[%c0, %c0_0] : memref<8x32xf32, #tpu.memory_space<vmem>>, vector<8x32xf32>
    %c0_1 = arith.constant 0 : index
    %c0_2 = arith.constant 0 : index
    %1 = vector.load %arg2[%c0_1, %c0_2] : memref<16x32xf32, #tpu.memory_space<vmem>>, vector<16x32xf32>
    %cst = arith.constant dense<0.000000e+00> : vector<16x8xf32>
    %2 = tpu.matmul %1, %0, %cst {dimension_numbers = #tpu.dot_dimension_numbers<[1], [1], [0], [0], [0, 0, 1, 0], [], []>} : vector<16x32xf32>, vector<8x32xf32>, vector<16x8xf32> -> vector<16x8xf32>
    %c0_3 = arith.constant 0 : index
    %c0_4 = arith.constant 0 : index
    %3 = vector.load %arg3[%c0_3, %c0_4] : memref<16x1xf32, #tpu.memory_space<vmem>>, vector<16x1xf32>
    %4 = vector.broadcast %3 : vector<16x1xf32> to vector<16x8xf32>
    %5 = arith.addf %2, %4 : vector<16x8xf32>
    %cst_5 = arith.constant 0.000000e+00 : f32
    %6 = vector.broadcast %cst_5 : f32 to vector<16x8xf32>
    %7 = arith.maximumf %5, %6 : vector<16x8xf32>
    %c0_6 = arith.constant 0 : index
    %c0_7 = arith.constant 0 : index
    %8 = vector.load %arg4[%c0_6, %c0_7] : memref<1x16xf32, #tpu.memory_space<vmem>>, vector<1x16xf32>
    %cst_8 = arith.constant dense<0.000000e+00> : vector<1x8xf32>
    %9 = tpu.matmul %8, %7, %cst_8 {dimension_numbers = #tpu.dot_dimension_numbers<[1], [0], [0], [1], [0, 0, 1, 1], [], []>} : vector<1x16xf32>, vector<16x8xf32>, vector<1x8xf32> -> vector<1x8xf32>
    %c0_9 = arith.constant 0 : index
    %10 = memref.load %arg5[%c0_9] : memref<1xf32, #tpu.memory_space<smem>>
    %11 = vector.broadcast %10 : f32 to vector<1x8xf32>
    %12 = arith.addf %9, %11 : vector<1x8xf32>
    %c0_10 = arith.constant 0 : index
    %c0_11 = arith.constant 0 : index
    %13 = vector.load %arg6[%c0_10, %c0_11] : memref<1x8xf32, #tpu.memory_space<vmem>>, vector<1x8xf32>
    tpu.vector_store %arg6[%c0_10, %c0_11], %12 {strides = array<i32>} : memref<1x8xf32, #tpu.memory_space<vmem>>, vector<1x8xf32>,
    return
  }
  func.func @transform_0(%arg0: i32) -> (i32, i32) {
    %c0_i32 = arith.constant 0 : i32
    %c0_i32_0 = arith.constant 0 : i32
    return %arg0, %c0_i32 : i32, i32
  }
  func.func @transform_1(%arg0: i32) -> (i32, i32) {
    %c0_i32 = arith.constant 0 : i32
    %c0_i32_0 = arith.constant 0 : i32
    %c0_i32_1 = arith.constant 0 : i32
    return %c0_i32, %c0_i32_0 : i32, i32
  }
  func.func @transform_2(%arg0: i32) -> (i32, i32) {
    %c0_i32 = arith.constant 0 : i32
    %c0_i32_0 = arith.constant 0 : i32
    %c0_i32_1 = arith.constant 0 : i32
    return %c0_i32, %c0_i32_0 : i32, i32
  }
  func.func @transform_3(%arg0: i32) -> (i32, i32) {
    %c0_i32 = arith.constant 0 : i32
    %c0_i32_0 = arith.constant 0 : i32
    %c0_i32_1 = arith.constant 0 : i32
    return %c0_i32, %c0_i32_0 : i32, i32
  }
  func.func @transform_4(%arg0: i32) -> i32 {
    %c0_i32 = arith.constant 0 : i32
    %c0_i32_0 = arith.constant 0 : i32
    return %c0_i32 : i32
  }
  func.func @transform_5(%arg0: i32) -> (i32, i32) {
    %c0_i32 = arith.constant 0 : i32
    %c0_i32_0 = arith.constant 0 : i32
    return %c0_i32, %arg0 : i32, i32
  }
}

</mosaic_0001>

<bundles_post_ra>
// kernel: tpu_custom_call.1
= control target key start
LH: loop header
LB: loop body
LE: loop exit
PB: predicated region body
PF: predicated region fallthrough
CT: control target
= control target key end

     0   :  { %11 = vsyncpa [#allocation4], 0  ;;  %s250_s0 = inlined_call_operand.hbm [shape: f32[8,32], index: 0, kind: input, shape index: {}]   ;;  %s251_s1 = inlined_call_operand.vmem [shape: f32[16,32], index: 1, kind: input, shape index: {}]   ;;  %s252_s2 = inlined_call_operand.vmem [shape: f32[16,1], index: 2, kind: input, shape index: {}]   ;;  %s253_s3 = inlined_call_operand.vmem [shape: f32[1,16], index: 3, kind: input, shape index: {}]   ;;  %s254_s4 = inlined_call_operand.<no memory space> [shape: f32[1], index: 4, kind: input, shape index: {}]   ;;  %s255_s5 = inlined_call_operand.hbm [shape: f32[1,8], index: 5, kind: output, shape index: {}]  }
   0x1   :  { %12 = vsyncpa [#allocation5], 0  ;;  %s18_s20 = sshll.u32 %s250_s0, 4  ;;  %s193_s21 = smov [#allocation3]   ;;  %s19_s20 = int_to_ptr.hbm [resolvable:$true] %s18_s20 }
   0x2   :  { %s20_s22 = sshll.u32 %s193_s21, 4  ;;  %s21_s22 = int_to_ptr.vmem [resolvable:$true] %s20_s22 }
   0x3   :  { %23 = dma.hbm_to_vmem [thread:$0]  %s19_s20, 128, %s21_s22, [#allocation4]  }
   0x4   :  { %189 = dma.done.wait [#allocation4], 128  }
   0x5   :  { %190 = vsyncadd [#allocation4], 4294967168  ;;  %v194_v0 = vmov 0   ;;  %vm51_vm0 = vcmask 261120   ;;  %v36_v1 = vld [vmem:[#allocation3] sm:$0xff]  ;;  %v38_v3 = vld [vmem:[%s251_s1 + $0x8] sm:$0xff]  ;;  %v88_v15 = vstv %s254_s4 }
   0x6   :  { %140 = vset.pattern.permute.xlu0 %v194_v0  ;;  %132 = vmatpush.xpose.msk.msra.mxu0 %vm51_vm0, %v36_v1  ;;  %v37_v2 = vld [vmem:[%s251_s1] sm:$0xff]  ;;  %v40_v4 = vld [vmem:[%s252_s2 + $0x8] sm:$0xff]  ;;  %vm89_vm1 = vcmask 130048   ;;  %s122_s11 = sshll.u32 %s255_s5, 4  ;;  %vm113_vm2 = vcmask 57344   ;;  %s123_s11 = int_to_ptr.hbm [resolvable:$true] %s122_s11 }
   0x7   :  { %136 = vmatpush.xpose.msk.msra.mxu2 %vm51_vm0, %v36_v1  ;;  %48 = vperm.xlu0 %140, %v40_v4   ;;  %v39_v5 = vld [vmem:[%s252_s2] sm:$0xff]  ;;  %s195_s2 = smov [#allocation6]  }
   0x8   :  { %v86_v14 = vld [vmem:[%s253_s3] sm:$0x1]  ;;  %s120_s8 = sshll.u32 %s195_s2, 4  ;;  %s121_s8 = int_to_ptr.vmem [resolvable:$true] %s120_s8 }
   0x9   :  { %133 = vmatmul.msk.f32.vlgmr.msra.gmra.mxu0 %vm51_vm0, %v37_v2 }
   0xa   :  { %134 = vmatmul.msk.f32.vlgmr.msra.gmra.mxu2 %vm51_vm0, %v38_v3 }
   0xf   :  { %43 = vperm.xlu0 %140, %v39_v5  }
  0x79   :  { %v49_v6 = vpop.permute.xlu0 %48 }
  0x81   :  { %v44_v7 = vpop.permute.xlu0 %43 }
  0x86   :  { %v78_v8 = vpop.f32.mrf.mxu0 }
  0x87   :  { %v79_v10 = vadd.f32 %v78_v8, %v44_v7 }
  0x89   :  { %v84_v13 = vmax.f32 %v79_v10, 0.0 }
  0x8d   :  { %v81_v9 = vpop.f32.mrf.mxu2 }
  0x8e   :  { %v82_v11 = vadd.f32 %v81_v9, %v49_v6 }
  0x90   :  { %v85_v12 = vmax.f32 %v82_v11, 0.0 }
  0x92   :  { %107 = vmatpush.msra.mxu1 %v85_v12 }
  0x94   :  { %108 = vmatpush.msra.mxu1 %v84_v13 }
  0x95   :  { %135 = vmatmul.msk.f32.vlgmr.msra.gmra.mxu1 %vm89_vm1, %v86_v14 }
 0x112   :  { %v110_v16 = vpop.f32.mrf.mxu1 }
 0x113   :  { %v111_v17 = vadd.f32 %v110_v16, %v88_v15 }
 0x115   :  { %114 = vst.msk [vmem:[#allocation6] sm:$0x1] %vm113_vm2, %v111_v17 }
 0x116   :  { %125 = dma.vmem_to_hbm [thread:$0]  %s121_s8, 16, %s123_s11, [#allocation5]  }
 0x117   :  { %191 = dma.done.wait [#allocation5], 16  }
 0x118   :  { %192 = vsyncadd [#allocation5], 4294967280 }
 0x119   :  { %130 = vsyncpa [#allocation4], 1 }
 0x11a   :  { %131 = vsyncpa [#allocation5], 1 }

</bundles_post_ra>
